<compile_context>
chip_gen: v7x
topology: tpu7x:2x2x1
jax: 0.10.0
libtpu: 0.0.40
codegen_flags: <defaults>
</compile_context>

<pallas_src>
import functools

import jax
import jax.numpy as jnp
from jax.experimental import pallas as pl
from jax.experimental.pallas import tpu as pltpu

_VMEM_LIMIT = 48 * 1024 * 1024  # safe on v5e/v6e (128 MiB) and v7x (64 MiB) physical VMEM
_KRON_MAX_ELEMS = 2 * 1024 * 1024  # use single-matmul upsample when kron matrix is small


def _round_up(x, m):
    return (x + m - 1) // m * m


# ------------------------- Pallas kernels (hot path) -------------------------

def _mm_bias_kernel(a_ref, b_ref, bias_ref, o_ref, acc_ref, *, relu):
    """Tiled matmul with f32 accumulator; bias/ReLU applied only on the last K step."""
    k = pl.program_id(2)

    @pl.when(k == 0)
    def _init():
        acc_ref[...] = jnp.zeros_like(acc_ref)

    acc_ref[...] += jnp.dot(a_ref[...], b_ref[...], preferred_element_type=jnp.float32)

    @pl.when(k == pl.num_programs(2) - 1)
    def _finalize():
        acc = acc_ref[...] + bias_ref[...]
        if relu:
            acc = jnp.maximum(acc, 0.0)
        o_ref[...] = acc.astype(o_ref.dtype)


def _aspp_mm_kernel(a1_ref, b1_ref, a2_ref, b2_ref, bias_ref, o_ref, acc_ref):
    """Two-branch (dilated) classifier fused: acc += a1@b1 + a2@b2, bias at final K step."""
    k = pl.program_id(2)

    @pl.when(k == 0)
    def _init():
        acc_ref[...] = jnp.zeros_like(acc_ref)

    acc_ref[...] += jnp.dot(a1_ref[...], b1_ref[...], preferred_element_type=jnp.float32)
    acc_ref[...] += jnp.dot(a2_ref[...], b2_ref[...], preferred_element_type=jnp.float32)

    @pl.when(k == pl.num_programs(2) - 1)
    def _finalize():
        o_ref[...] = (acc_ref[...] + bias_ref[...]).astype(o_ref.dtype)


def _upsample_plane_kernel(x_ref, ah_ref, awt_ref, o_ref):
    """Fallback separable bilinear interp for one (n, c) plane: out = Ah @ x @ Aw^T."""
    t = jnp.dot(ah_ref[...], x_ref[0], preferred_element_type=jnp.float32)   # (out_h, Wf)
    o_ref[0] = jnp.dot(t, awt_ref[...], preferred_element_type=jnp.float32)  # (out_h, out_w)


# --------------------------- matmul wrappers ---------------------------------

def _tile_sizes(M, N, K, tm, tn, tk):
    tm = min(tm, _round_up(M, 16))    # sublane-safe for bf16 blocks
    tn = min(tn, _round_up(N, 128))   # lane-dense output (pad Cout up to 128)
    tk = min(tk, _round_up(K, 128))
    return tm, tn, tk


def pallas_matmul_bias(a, b, bias, relu=False, tm=512, tn=256, tk=512,
                       out_dtype=jnp.float32, cast_bf16=True):
    """(M,K)@(K,N) + bias, optional ReLU. f32 accumulation; inputs bf16 unless disabled."""
    M, K = a.shape
    K2, N = b.shape
    assert K == K2
    tm, tn, tk = _tile_sizes(M, N, K, tm, tn, tk)
    Mp, Np, Kp = _round_up(M, tm), _round_up(N, tn), _round_up(K, tk)
    in_dt = jnp.bfloat16 if cast_bf16 else jnp.float32

    a_p = jnp.pad(a.astype(in_dt), ((0, Mp - M), (0, Kp - K)))
    b_p = jnp.pad(b.astype(in_dt), ((0, Kp - K), (0, Np - N)))
    bias_p = jnp.pad(bias.astype(jnp.float32), (0, Np - N)).reshape(1, Np)

    out = pl.pallas_call(
        functools.partial(_mm_bias_kernel, relu=relu),
        out_shape=jax.ShapeDtypeStruct((Mp, Np), out_dtype),
        grid_spec=pltpu.PrefetchScalarGridSpec(
            num_scalar_prefetch=0,
            grid=(Mp // tm, Np // tn, Kp // tk),
            in_specs=[
                pl.BlockSpec((tm, tk), lambda i, j, k: (i, k)),
                pl.BlockSpec((tk, tn), lambda i, j, k: (k, j)),
                pl.BlockSpec((1, tn), lambda i, j, k: (0, j)),
            ],
            out_specs=pl.BlockSpec((tm, tn), lambda i, j, k: (i, j)),
            scratch_shapes=[pltpu.VMEM((tm, tn), jnp.float32)],
        ),
        compiler_params=pltpu.CompilerParams(
            dimension_semantics=("parallel", "parallel", "arbitrary"),
            vmem_limit_bytes=_VMEM_LIMIT,
        ),
    )(a_p, b_p, bias_p)
    return out[:M, :N]


def pallas_aspp_matmul(a1, a2, b1, b2, bias, tm=512, tn=256, tk=512,
                       out_dtype=jnp.float32):
    """Fused two-branch GEMM: a1@b1 + a2@b2 + bias, no concatenation in HBM."""
    M, K = a1.shape
    _, N = b1.shape
    assert a2.shape == (M, K) and b2.shape == (K, N)
    tm, tn, tk = _tile_sizes(M, N, K, tm, tn, tk)
    Mp, Np, Kp = _round_up(M, tm), _round_up(N, tn), _round_up(K, tk)

    def pad_a(a):
        return jnp.pad(a.astype(jnp.bfloat16), ((0, Mp - M), (0, Kp - K)))

    def pad_b(b):
        return jnp.pad(b.astype(jnp.bfloat16), ((0, Kp - K), (0, Np - N)))

    bias_p = jnp.pad(bias.astype(jnp.float32), (0, Np - N)).reshape(1, Np)

    out = pl.pallas_call(
        _aspp_mm_kernel,
        out_shape=jax.ShapeDtypeStruct((Mp, Np), out_dtype),
        grid_spec=pltpu.PrefetchScalarGridSpec(
            num_scalar_prefetch=0,
            grid=(Mp // tm, Np // tn, Kp // tk),
            in_specs=[
                pl.BlockSpec((tm, tk), lambda i, j, k: (i, k)),
                pl.BlockSpec((tk, tn), lambda i, j, k: (k, j)),
                pl.BlockSpec((tm, tk), lambda i, j, k: (i, k)),
                pl.BlockSpec((tk, tn), lambda i, j, k: (k, j)),
                pl.BlockSpec((1, tn), lambda i, j, k: (0, j)),
            ],
            out_specs=pl.BlockSpec((tm, tn), lambda i, j, k: (i, j)),
            scratch_shapes=[pltpu.VMEM((tm, tn), jnp.float32)],
        ),
        compiler_params=pltpu.CompilerParams(
            dimension_semantics=("parallel", "parallel", "arbitrary"),
            vmem_limit_bytes=_VMEM_LIMIT,
        ),
    )(pad_a(a1), pad_b(b1), pad_a(a2), pad_b(b2), bias_p)
    return out[:M, :N]


# ------------------------------ JAX glue ------------------------------------

def im2col_nhwc(x, kh, kw, stride, dilation, padding):
    """x: (N, H, W, C) -> (N*Ho*Wo, kh*kw*C); channel-last concat (no layout transpose)."""
    N, H, W, C = x.shape
    Ho = (H + 2 * padding - dilation * (kh - 1) - 1) // stride + 1
    Wo = (W + 2 * padding - dilation * (kw - 1) - 1) // stride + 1
    xp = jnp.pad(x, ((0, 0), (padding, padding), (padding, padding), (0, 0)))
    cols = []
    for i in range(kh):
        for j in range(kw):
            hs, ws = i * dilation, j * dilation
            patch = xp[:, hs:hs + stride * (Ho - 1) + 1:stride,
                       ws:ws + stride * (Wo - 1) + 1:stride, :]
            cols.append(patch)
    col = jnp.concatenate(cols, axis=-1)  # (N, Ho, Wo, kh*kw*C), feature order (kh, kw, C)
    return col.reshape(N * Ho * Wo, kh * kw * C), Ho, Wo


def conv2d_nhwc(x, w, b, stride=1, dilation=1, padding=0, relu=False):
    """PyTorch-semantics Conv2d (NHWC activations) via im2col + tiled Pallas matmul."""
    Cout, Cin, kh, kw = w.shape
    col, Ho, Wo = im2col_nhwc(x, kh, kw, stride, dilation, padding)
    wmat = jnp.transpose(w, (2, 3, 1, 0)).reshape(kh * kw * Cin, Cout)   # (kh,kw,Cin) order
    out = pallas_matmul_bias(col, wmat, b, relu=relu)
    N = x.shape[0]
    return out.reshape(N, Ho, Wo, Cout), Ho, Wo


def _interp_matrix(in_size, out_size):
    """Matrix reproducing F.interpolate bilinear, align_corners=False (PyTorch clamp)."""
    scale = in_size / out_size
    dst = jnp.arange(out_size, dtype=jnp.float32)
    src = (dst + 0.5) * scale - 0.5
    src = jnp.maximum(src, 0.0)
    i0 = jnp.minimum(jnp.floor(src).astype(jnp.int32), in_size - 1)
    i1 = jnp.minimum(i0 + 1, in_size - 1)
    lam = src - i0.astype(jnp.float32)
    rows = jnp.arange(out_size)
    m = jnp.zeros((out_size, in_size), jnp.float32)
    m = m.at[rows, i0].add(1.0 - lam)
    m = m.at[rows, i1].add(lam)
    return m


def bilinear_upsample(x_nchw, out_h, out_w):
    """x: (N, C, Hf, Wf) -> (N, C, out_h, out_w), PyTorch bilinear (align_corners=False)."""
    N, C, Hf, Wf = x_nchw.shape
    Ah = _interp_matrix(Hf, out_h)          # (out_h, Hf)
    Aw = _interp_matrix(Wf, out_w)          # (out_w, Wf)

    if Hf * Wf * out_h * out_w <= _KRON_MAX_ELEMS:
        # Single lane-dense Pallas matmul:
        #   out[p, i*out_w + j] = sum_{a,b} x[p, a*Wf + b] * Ah[i,a] * Aw[j,b]
        # kron[a*Wf + b, i*out_w + j] = Ah[i,a] * Aw[j,b]
        kron = jnp.einsum('ia,jb->abij', Ah, Aw).reshape(Hf * Wf, out_h * out_w)
        x_flat = x_nchw.reshape(N * C, Hf * Wf).astype(jnp.float32)
        zero_bias = jnp.zeros((out_h * out_w,), jnp.float32)
        out = pallas_matmul_bias(x_flat, kron, zero_bias, relu=False,
                                 cast_bf16=False)               # keep interp in f32
        return out.reshape(N, C, out_h, out_w)

    # Fallback for large feature maps: separable per-plane kernel, out = Ah @ x @ Aw^T.
    AwT = Aw.T                              # (Wf, out_w)
    xi = x_nchw.reshape(N * C, Hf, Wf).astype(jnp.float32)
    out = pl.pallas_call(
        _upsample_plane_kernel,
        out_shape=jax.ShapeDtypeStruct((N * C, out_h, out_w), jnp.float32),
        grid_spec=pltpu.PrefetchScalarGridSpec(
            num_scalar_prefetch=0,
            grid=(N * C,),
            in_specs=[
                pl.BlockSpec((1, Hf, Wf), lambda i: (i, 0, 0)),
                pl.BlockSpec((out_h, Hf), lambda i: (0, 0)),
                pl.BlockSpec((Wf, out_w), lambda i: (0, 0)),
            ],
            out_specs=pl.BlockSpec((1, out_h, out_w), lambda i: (i, 0, 0)),
        ),
        compiler_params=pltpu.CompilerParams(
            dimension_semantics=("parallel",),
            vmem_limit_bytes=_VMEM_LIMIT,
        ),
    )(xi, Ah, AwT)
    return out.reshape(N, C, out_h, out_w)


# ------------------------------ DeepLabV2 -----------------------------------
# Since DeepLabV2 takes `backbone` and `classifier` as constructor arguments, we
# instantiate concrete small ones: a 3-conv stride-8 backbone and a 2-branch
# dilated-conv ASPP classifier (branch outputs summed).

def deeplab_v2_forward(x, params, upsampling=8):
    # x: NCHW (PyTorch layout) -> NHWC internally.
    xh = jnp.transpose(x, (0, 2, 3, 1))

    # backbone: three stride-2 conv3x3 + ReLU (output stride 8)
    h, _, _ = conv2d_nhwc(xh, params['w1'], params['b1'], stride=2, padding=1, relu=True)
    h, _, _ = conv2d_nhwc(h, params['w2'], params['b2'], stride=2, padding=1, relu=True)
    h, fh, fw = conv2d_nhwc(h, params['w3'], params['b3'], stride=2, padding=1, relu=True)

    # classifier: ASPP with two dilated 3x3 branches (rates 1 and 2), summed.
    # Fused into one Pallas kernel (dual-operand accumulate) -- no HBM concat.
    col1, Ho, Wo = im2col_nhwc(h, 3, 3, stride=1, dilation=1, padding=1)
    col2, _, _ = im2col_nhwc(h, 3, 3, stride=1, dilation=2, padding=2)
    Cout, Cin, _, _ = params['cw1'].shape
    w1m = jnp.transpose(params['cw1'], (2, 3, 1, 0)).reshape(9 * Cin, Cout)
    w2m = jnp.transpose(params['cw2'], (2, 3, 1, 0)).reshape(9 * Cin, Cout)
    logits = pallas_aspp_matmul(col1, col2, w1m, w2m, params['cb1'] + params['cb2'])

    N = x.shape[0]
    logits = logits.reshape(N, Ho, Wo, Cout).transpose(0, 3, 1, 2)  # small NCHW tensor

    # out = F.interpolate(x, size=(fh*upsampling, fw*upsampling), mode='bilinear')
    return bilinear_upsample(logits, fh * upsampling, fw * upsampling)


if __name__ == "__main__":
    key = jax.random.PRNGKey(0)
    ks = jax.random.split(key, 11)

    num_classes = 5
    x = jax.random.normal(ks[0], (2, 4, 16, 16), jnp.float32)   # NCHW image batch

    params = {
        'w1': 0.1 * jax.random.normal(ks[1], (8, 4, 3, 3), jnp.float32),
        'b1': 0.01 * jax.random.normal(ks[2], (8,), jnp.float32),
        'w2': 0.1 * jax.random.normal(ks[3], (16, 8, 3, 3), jnp.float32),
        'b2': 0.01 * jax.random.normal(ks[4], (16,), jnp.float32),
        'w3': 0.1 * jax.random.normal(ks[5], (32, 16, 3, 3), jnp.float32),
        'b3': 0.01 * jax.random.normal(ks[6], (32,), jnp.float32),
        'cw1': 0.1 * jax.random.normal(ks[7], (num_classes, 32, 3, 3), jnp.float32),
        'cb1': 0.01 * jax.random.normal(ks[8], (num_classes,), jnp.float32),
        'cw2': 0.1 * jax.random.normal(ks[9], (num_classes, 32, 3, 3), jnp.float32),
        'cb2': 0.01 * jax.random.normal(ks[10], (num_classes,), jnp.float32),
    }

    out = jax.jit(deeplab_v2_forward)(x, params)
    out = jax.block_until_ready(out)
    assert out.shape == (2, num_classes, 16, 16), out.shape
    assert out.dtype == jnp.float32
    print("KERNEL_OK")
</pallas_src>

<mosaic_0001>
module attributes {stable_mosaic.version = 11 : i64} {
  func.func private @main(%arg0: i32) attributes {dimension_semantics = [#tpu.dimension_semantics<core_parallel>], iteration_bounds = array<i64: 2>, tpu.core_type = #tpu.core_type<sc_scalar_subcore>, window_params = []} {
    return
  }
}

module attributes {stable_mosaic.version = 11 : i64} {
  func.func private @main(%arg0: i32) attributes {dimension_semantics = [#tpu.dimension_semantics<core_parallel>], iteration_bounds = array<i64: 2>, tpu.core_type = #tpu.core_type<sc_scalar_subcore>, window_params = []} {
    return
  }
}

module attributes {stable_mosaic.version = 11 : i64} {
  func.func @_mm_bias_kernel(%arg0: i32, %arg1: i32, %arg2: i32, %arg3: memref<128x128xbf16, #tpu.memory_space<vmem>>, %arg4: memref<128x128xbf16, #tpu.memory_space<vmem>>, %arg5: memref<1x128xf32, #tpu.memory_space<vmem>>, %arg6: memref<128x128xf32, #tpu.memory_space<vmem>>, %arg7: memref<128x128xf32, #tpu.memory_space<vmem>>) attributes {dimension_semantics = [#tpu.dimension_semantics<parallel>, #tpu.dimension_semantics<parallel>, #tpu.dimension_semantics<arbitrary>], iteration_bounds = array<i64: 1, 1, 1>, scalar_prefetch = 0 : i64, scratch_operands = 1 : i64, tpu.core_type = #tpu.core_type<tc>, window_params = [{transform_indices = @transform_0, window_bounds = array<i64: 128, 128>}, {transform_indices = @transform_1, window_bounds = array<i64: 128, 128>}, {transform_indices = @transform_2, window_bounds = array<i64: 1, 128>}, {transform_indices = @transform_3, window_bounds = array<i64: 128, 128>}]} {
    %c0_i32 = arith.constant 0 : i32
    %0 = arith.cmpi eq, %arg2, %c0_i32 : i32
    %1 = arith.extui %0 : i1 to i32
    %c0_i32_0 = arith.constant 0 : i32
    %2 = arith.cmpi ne, %1, %c0_i32_0 : i32
    scf.if %2 {
      %cst_10 = arith.constant 0.000000e+00 : f32
      %12 = vector.broadcast %cst_10 : f32 to vector<128x128xf32>
      %c0_11 = arith.constant 0 : index
      %c0_12 = arith.constant 0 : index
      %13 = vector.load %arg7[%c0_11, %c0_12] : memref<128x128xf32, #tpu.memory_space<vmem>>, vector<128x128xf32>
      tpu.vector_store %arg7[%c0_11, %c0_12], %12 {strides = array<i32>} : memref<128x128xf32, #tpu.memory_space<vmem>>, vector<128x128xf32>,
    } else {
    }
    %c0 = arith.constant 0 : index
    %c0_1 = arith.constant 0 : index
    %3 = vector.load %arg7[%c0, %c0_1] : memref<128x128xf32, #tpu.memory_space<vmem>>, vector<128x128xf32>
    %c0_2 = arith.constant 0 : index
    %c0_3 = arith.constant 0 : index
    %4 = vector.load %arg3[%c0_2, %c0_3] : memref<128x128xbf16, #tpu.memory_space<vmem>>, vector<128x128xbf16>
    %c0_4 = arith.constant 0 : index
    %c0_5 = arith.constant 0 : index
    %5 = vector.load %arg4[%c0_4, %c0_5] : memref<128x128xbf16, #tpu.memory_space<vmem>>, vector<128x128xbf16>
    %cst = arith.constant dense<0.000000e+00> : vector<128x128xf32>
    %6 = tpu.matmul %4, %5, %cst {dimension_numbers = #tpu.dot_dimension_numbers<[1], [0], [0], [1], [0, 0, 1, 1], [], []>} : vector<128x128xbf16>, vector<128x128xbf16>, vector<128x128xf32> -> vector<128x128xf32>
    %7 = arith.addf %3, %6 : vector<128x128xf32>
    %c0_6 = arith.constant 0 : index
    %c0_7 = arith.constant 0 : index
    %8 = vector.load %arg7[%c0_6, %c0_7] : memref<128x128xf32, #tpu.memory_space<vmem>>, vector<128x128xf32>
    tpu.vector_store %arg7[%c0_6, %c0_7], %7 {strides = array<i32>} : memref<128x128xf32, #tpu.memory_space<vmem>>, vector<128x128xf32>,
    %c0_i32_8 = arith.constant 0 : i32
    %9 = arith.cmpi eq, %arg2, %c0_i32_8 : i32
    %10 = arith.extui %9 : i1 to i32
    %c0_i32_9 = arith.constant 0 : i32
    %11 = arith.cmpi ne, %10, %c0_i32_9 : i32
    scf.if %11 {
      %c0_10 = arith.constant 0 : index
      %c0_11 = arith.constant 0 : index
      %12 = vector.load %arg7[%c0_10, %c0_11] : memref<128x128xf32, #tpu.memory_space<vmem>>, vector<128x128xf32>
      %c0_12 = arith.constant 0 : index
      %c0_13 = arith.constant 0 : index
      %13 = vector.load %arg5[%c0_12, %c0_13] : memref<1x128xf32, #tpu.memory_space<vmem>>, vector<1x128xf32>
      %14 = vector.broadcast %13 : vector<1x128xf32> to vector<128x128xf32>
      %15 = arith.addf %12, %14 : vector<128x128xf32>
      %cst_14 = arith.constant 0.000000e+00 : f32
      %16 = vector.broadcast %cst_14 : f32 to vector<128x128xf32>
      %17 = arith.maximumf %15, %16 : vector<128x128xf32>
      %c0_15 = arith.constant 0 : index
      %c0_16 = arith.constant 0 : index
      %18 = vector.load %arg6[%c0_15, %c0_16] : memref<128x128xf32, #tpu.memory_space<vmem>>, vector<128x128xf32>
      tpu.vector_store %arg6[%c0_15, %c0_16], %17 {strides = array<i32>} : memref<128x128xf32, #tpu.memory_space<vmem>>, vector<128x128xf32>,
    } else {
    }
    return
  }
  func.func @transform_0(%arg0: i32, %arg1: i32, %arg2: i32) -> (i32, i32) {
    %c0_i32 = arith.constant 0 : i32
    return %arg0, %arg2 : i32, i32
  }
  func.func @transform_1(%arg0: i32, %arg1: i32, %arg2: i32) -> (i32, i32) {
    %c0_i32 = arith.constant 0 : i32
    return %arg2, %arg1 : i32, i32
  }
  func.func @transform_2(%arg0: i32, %arg1: i32, %arg2: i32) -> (i32, i32) {
    %c0_i32 = arith.constant 0 : i32
    %c0_i32_0 = arith.constant 0 : i32
    return %c0_i32, %arg1 : i32, i32
  }
  func.func @transform_3(%arg0: i32, %arg1: i32, %arg2: i32) -> (i32, i32) {
    %c0_i32 = arith.constant 0 : i32
    return %arg0, %arg1 : i32, i32
  }
}

module attributes {stable_mosaic.version = 11 : i64} {
  func.func @_mm_bias_kernel(%arg0: i32, %arg1: i32, %arg2: i32, %arg3: memref<32x128xbf16, #tpu.memory_space<vmem>>, %arg4: memref<128x128xbf16, #tpu.memory_space<vmem>>, %arg5: memref<1x128xf32, #tpu.memory_space<vmem>>, %arg6: memref<32x128xf32, #tpu.memory_space<vmem>>, %arg7: memref<32x128xf32, #tpu.memory_space<vmem>>) attributes {dimension_semantics = [#tpu.dimension_semantics<parallel>, #tpu.dimension_semantics<parallel>, #tpu.dimension_semantics<arbitrary>], iteration_bounds = array<i64: 1, 1, 1>, scalar_prefetch = 0 : i64, scratch_operands = 1 : i64, tpu.core_type = #tpu.core_type<tc>, window_params = [{transform_indices = @transform_0, window_bounds = array<i64: 32, 128>}, {transform_indices = @transform_1, window_bounds = array<i64: 128, 128>}, {transform_indices = @transform_2, window_bounds = array<i64: 1, 128>}, {transform_indices = @transform_3, window_bounds = array<i64: 32, 128>}]} {
    %c0_i32 = arith.constant 0 : i32
    %0 = arith.cmpi eq, %arg2, %c0_i32 : i32
    %1 = arith.extui %0 : i1 to i32
    %c0_i32_0 = arith.constant 0 : i32
    %2 = arith.cmpi ne, %1, %c0_i32_0 : i32
    scf.if %2 {
      %cst_10 = arith.constant 0.000000e+00 : f32
      %12 = vector.broadcast %cst_10 : f32 to vector<32x128xf32>
      %c0_11 = arith.constant 0 : index
      %c0_12 = arith.constant 0 : index
      %13 = vector.load %arg7[%c0_11, %c0_12] : memref<32x128xf32, #tpu.memory_space<vmem>>, vector<32x128xf32>
      tpu.vector_store %arg7[%c0_11, %c0_12], %12 {strides = array<i32>} : memref<32x128xf32, #tpu.memory_space<vmem>>, vector<32x128xf32>,
    } else {
    }
    %c0 = arith.constant 0 : index
    %c0_1 = arith.constant 0 : index
    %3 = vector.load %arg7[%c0, %c0_1] : memref<32x128xf32, #tpu.memory_space<vmem>>, vector<32x128xf32>
    %c0_2 = arith.constant 0 : index
    %c0_3 = arith.constant 0 : index
    %4 = vector.load %arg3[%c0_2, %c0_3] : memref<32x128xbf16, #tpu.memory_space<vmem>>, vector<32x128xbf16>
    %c0_4 = arith.constant 0 : index
    %c0_5 = arith.constant 0 : index
    %5 = vector.load %arg4[%c0_4, %c0_5] : memref<128x128xbf16, #tpu.memory_space<vmem>>, vector<128x128xbf16>
    %cst = arith.constant dense<0.000000e+00> : vector<32x128xf32>
    %6 = tpu.matmul %4, %5, %cst {dimension_numbers = #tpu.dot_dimension_numbers<[1], [0], [0], [1], [0, 0, 1, 1], [], []>} : vector<32x128xbf16>, vector<128x128xbf16>, vector<32x128xf32> -> vector<32x128xf32>
    %7 = arith.addf %3, %6 : vector<32x128xf32>
    %c0_6 = arith.constant 0 : index
    %c0_7 = arith.constant 0 : index
    %8 = vector.load %arg7[%c0_6, %c0_7] : memref<32x128xf32, #tpu.memory_space<vmem>>, vector<32x128xf32>
    tpu.vector_store %arg7[%c0_6, %c0_7], %7 {strides = array<i32>} : memref<32x128xf32, #tpu.memory_space<vmem>>, vector<32x128xf32>,
    %c0_i32_8 = arith.constant 0 : i32
    %9 = arith.cmpi eq, %arg2, %c0_i32_8 : i32
    %10 = arith.extui %9 : i1 to i32
    %c0_i32_9 = arith.constant 0 : i32
    %11 = arith.cmpi ne, %10, %c0_i32_9 : i32
    scf.if %11 {
      %c0_10 = arith.constant 0 : index
      %c0_11 = arith.constant 0 : index
      %12 = vector.load %arg7[%c0_10, %c0_11] : memref<32x128xf32, #tpu.memory_space<vmem>>, vector<32x128xf32>
      %c0_12 = arith.constant 0 : index
      %c0_13 = arith.constant 0 : index
      %13 = vector.load %arg5[%c0_12, %c0_13] : memref<1x128xf32, #tpu.memory_space<vmem>>, vector<1x128xf32>
      %14 = vector.broadcast %13 : vector<1x128xf32> to vector<32x128xf32>
      %15 = arith.addf %12, %14 : vector<32x128xf32>
      %cst_14 = arith.constant 0.000000e+00 : f32
      %16 = vector.broadcast %cst_14 : f32 to vector<32x128xf32>
      %17 = arith.maximumf %15, %16 : vector<32x128xf32>
      %c0_15 = arith.constant 0 : index
      %c0_16 = arith.constant 0 : index
      %18 = vector.load %arg6[%c0_15, %c0_16] : memref<32x128xf32, #tpu.memory_space<vmem>>, vector<32x128xf32>
      tpu.vector_store %arg6[%c0_15, %c0_16], %17 {strides = array<i32>} : memref<32x128xf32, #tpu.memory_space<vmem>>, vector<32x128xf32>,
    } else {
    }
    return
  }
  func.func @transform_0(%arg0: i32, %arg1: i32, %arg2: i32) -> (i32, i32) {
    %c0_i32 = arith.constant 0 : i32
    return %arg0, %arg2 : i32, i32
  }
  func.func @transform_1(%arg0: i32, %arg1: i32, %arg2: i32) -> (i32, i32) {
    %c0_i32 = arith.constant 0 : i32
    return %arg2, %arg1 : i32, i32
  }
  func.func @transform_2(%arg0: i32, %arg1: i32, %arg2: i32) -> (i32, i32) {
    %c0_i32 = arith.constant 0 : i32
    %c0_i32_0 = arith.constant 0 : i32
    return %c0_i32, %arg1 : i32, i32
  }
  func.func @transform_3(%arg0: i32, %arg1: i32, %arg2: i32) -> (i32, i32) {
    %c0_i32 = arith.constant 0 : i32
    return %arg0, %arg1 : i32, i32
  }
}

module attributes {stable_mosaic.version = 11 : i64} {
  func.func @_mm_bias_kernel(%arg0: i32, %arg1: i32, %arg2: i32, %arg3: memref<16x256xbf16, #tpu.memory_space<vmem>>, %arg4: memref<256x128xbf16, #tpu.memory_space<vmem>>, %arg5: memref<1x128xf32, #tpu.memory_space<vmem>>, %arg6: memref<16x128xf32, #tpu.memory_space<vmem>>, %arg7: memref<16x128xf32, #tpu.memory_space<vmem>>) attributes {dimension_semantics = [#tpu.dimension_semantics<parallel>, #tpu.dimension_semantics<parallel>, #tpu.dimension_semantics<arbitrary>], iteration_bounds = array<i64: 1, 1, 1>, scalar_prefetch = 0 : i64, scratch_operands = 1 : i64, tpu.core_type = #tpu.core_type<tc>, window_params = [{transform_indices = @transform_0, window_bounds = array<i64: 16, 256>}, {transform_indices = @transform_1, window_bounds = array<i64: 256, 128>}, {transform_indices = @transform_2, window_bounds = array<i64: 1, 128>}, {transform_indices = @transform_3, window_bounds = array<i64: 16, 128>}]} {
    %c0_i32 = arith.constant 0 : i32
    %0 = arith.cmpi eq, %arg2, %c0_i32 : i32
    %1 = arith.extui %0 : i1 to i32
    %c0_i32_0 = arith.constant 0 : i32
    %2 = arith.cmpi ne, %1, %c0_i32_0 : i32
    scf.if %2 {
      %cst_10 = arith.constant 0.000000e+00 : f32
      %12 = vector.broadcast %cst_10 : f32 to vector<16x128xf32>
      %c0_11 = arith.constant 0 : index
      %c0_12 = arith.constant 0 : index
      %13 = vector.load %arg7[%c0_11, %c0_12] : memref<16x128xf32, #tpu.memory_space<vmem>>, vector<16x128xf32>
      tpu.vector_store %arg7[%c0_11, %c0_12], %12 {strides = array<i32>} : memref<16x128xf32, #tpu.memory_space<vmem>>, vector<16x128xf32>,
    } else {
    }
    %c0 = arith.constant 0 : index
    %c0_1 = arith.constant 0 : index
    %3 = vector.load %arg7[%c0, %c0_1] : memref<16x128xf32, #tpu.memory_space<vmem>>, vector<16x128xf32>
    %c0_2 = arith.constant 0 : index
    %c0_3 = arith.constant 0 : index
    %4 = vector.load %arg3[%c0_2, %c0_3] : memref<16x256xbf16, #tpu.memory_space<vmem>>, vector<16x256xbf16>
    %c0_4 = arith.constant 0 : index
    %c0_5 = arith.constant 0 : index
    %5 = vector.load %arg4[%c0_4, %c0_5] : memref<256x128xbf16, #tpu.memory_space<vmem>>, vector<256x128xbf16>
    %cst = arith.constant dense<0.000000e+00> : vector<16x128xf32>
    %6 = tpu.matmul %4, %5, %cst {dimension_numbers = #tpu.dot_dimension_numbers<[1], [0], [0], [1], [0, 0, 1, 1], [], []>} : vector<16x256xbf16>, vector<256x128xbf16>, vector<16x128xf32> -> vector<16x128xf32>
    %7 = arith.addf %3, %6 : vector<16x128xf32>
    %c0_6 = arith.constant 0 : index
    %c0_7 = arith.constant 0 : index
    %8 = vector.load %arg7[%c0_6, %c0_7] : memref<16x128xf32, #tpu.memory_space<vmem>>, vector<16x128xf32>
    tpu.vector_store %arg7[%c0_6, %c0_7], %7 {strides = array<i32>} : memref<16x128xf32, #tpu.memory_space<vmem>>, vector<16x128xf32>,
    %c0_i32_8 = arith.constant 0 : i32
    %9 = arith.cmpi eq, %arg2, %c0_i32_8 : i32
    %10 = arith.extui %9 : i1 to i32
    %c0_i32_9 = arith.constant 0 : i32
    %11 = arith.cmpi ne, %10, %c0_i32_9 : i32
    scf.if %11 {
      %c0_10 = arith.constant 0 : index
      %c0_11 = arith.constant 0 : index
      %12 = vector.load %arg7[%c0_10, %c0_11] : memref<16x128xf32, #tpu.memory_space<vmem>>, vector<16x128xf32>
      %c0_12 = arith.constant 0 : index
      %c0_13 = arith.constant 0 : index
      %13 = vector.load %arg5[%c0_12, %c0_13] : memref<1x128xf32, #tpu.memory_space<vmem>>, vector<1x128xf32>
      %14 = vector.broadcast %13 : vector<1x128xf32> to vector<16x128xf32>
      %15 = arith.addf %12, %14 : vector<16x128xf32>
      %cst_14 = arith.constant 0.000000e+00 : f32
      %16 = vector.broadcast %cst_14 : f32 to vector<16x128xf32>
      %17 = arith.maximumf %15, %16 : vector<16x128xf32>
      %c0_15 = arith.constant 0 : index
      %c0_16 = arith.constant 0 : index
      %18 = vector.load %arg6[%c0_15, %c0_16] : memref<16x128xf32, #tpu.memory_space<vmem>>, vector<16x128xf32>
      tpu.vector_store %arg6[%c0_15, %c0_16], %17 {strides = array<i32>} : memref<16x128xf32, #tpu.memory_space<vmem>>, vector<16x128xf32>,
    } else {
    }
    return
  }
  func.func @transform_0(%arg0: i32, %arg1: i32, %arg2: i32) -> (i32, i32) {
    %c0_i32 = arith.constant 0 : i32
    return %arg0, %arg2 : i32, i32
  }
  func.func @transform_1(%arg0: i32, %arg1: i32, %arg2: i32) -> (i32, i32) {
    %c0_i32 = arith.constant 0 : i32
    return %arg2, %arg1 : i32, i32
  }
  func.func @transform_2(%arg0: i32, %arg1: i32, %arg2: i32) -> (i32, i32) {
    %c0_i32 = arith.constant 0 : i32
    %c0_i32_0 = arith.constant 0 : i32
    return %c0_i32, %arg1 : i32, i32
  }
  func.func @transform_3(%arg0: i32, %arg1: i32, %arg2: i32) -> (i32, i32) {
    %c0_i32 = arith.constant 0 : i32
    return %arg0, %arg1 : i32, i32
  }
}

module attributes {stable_mosaic.version = 11 : i64} {
  func.func @_aspp_mm_kernel(%arg0: i32, %arg1: i32, %arg2: i32, %arg3: memref<16x384xbf16, #tpu.memory_space<vmem>>, %arg4: memref<384x128xbf16, #tpu.memory_space<vmem>>, %arg5: memref<16x384xbf16, #tpu.memory_space<vmem>>, %arg6: memref<384x128xbf16, #tpu.memory_space<vmem>>, %arg7: memref<1x128xf32, #tpu.memory_space<vmem>>, %arg8: memref<16x128xf32, #tpu.memory_space<vmem>>, %arg9: memref<16x128xf32, #tpu.memory_space<vmem>>) attributes {dimension_semantics = [#tpu.dimension_semantics<parallel>, #tpu.dimension_semantics<parallel>, #tpu.dimension_semantics<arbitrary>], iteration_bounds = array<i64: 1, 1, 1>, scalar_prefetch = 0 : i64, scratch_operands = 1 : i64, tpu.core_type = #tpu.core_type<tc>, window_params = [{transform_indices = @transform_0, window_bounds = array<i64: 16, 384>}, {transform_indices = @transform_1, window_bounds = array<i64: 384, 128>}, {transform_indices = @transform_2, window_bounds = array<i64: 16, 384>}, {transform_indices = @transform_3, window_bounds = array<i64: 384, 128>}, {transform_indices = @transform_4, window_bounds = array<i64: 1, 128>}, {transform_indices = @transform_5, window_bounds = array<i64: 16, 128>}]} {
    %c0_i32 = arith.constant 0 : i32
    %0 = arith.cmpi eq, %arg2, %c0_i32 : i32
    %1 = arith.extui %0 : i1 to i32
    %c0_i32_0 = arith.constant 0 : i32
    %2 = arith.cmpi ne, %1, %c0_i32_0 : i32
    scf.if %2 {
      %cst_19 = arith.constant 0.000000e+00 : f32
      %18 = vector.broadcast %cst_19 : f32 to vector<16x128xf32>
      %c0_20 = arith.constant 0 : index
      %c0_21 = arith.constant 0 : index
      %19 = vector.load %arg9[%c0_20, %c0_21] : memref<16x128xf32, #tpu.memory_space<vmem>>, vector<16x128xf32>
      tpu.vector_store %arg9[%c0_20, %c0_21], %18 {strides = array<i32>} : memref<16x128xf32, #tpu.memory_space<vmem>>, vector<16x128xf32>,
    } else {
    }
    %c0 = arith.constant 0 : index
    %c0_1 = arith.constant 0 : index
    %3 = vector.load %arg9[%c0, %c0_1] : memref<16x128xf32, #tpu.memory_space<vmem>>, vector<16x128xf32>
    %c0_2 = arith.constant 0 : index
    %c0_3 = arith.constant 0 : index
    %4 = vector.load %arg3[%c0_2, %c0_3] : memref<16x384xbf16, #tpu.memory_space<vmem>>, vector<16x384xbf16>
    %c0_4 = arith.constant 0 : index
    %c0_5 = arith.constant 0 : index
    %5 = vector.load %arg4[%c0_4, %c0_5] : memref<384x128xbf16, #tpu.memory_space<vmem>>, vector<384x128xbf16>
    %cst = arith.constant dense<0.000000e+00> : vector<16x128xf32>
    %6 = tpu.matmul %4, %5, %cst {dimension_numbers = #tpu.dot_dimension_numbers<[1], [0], [0], [1], [0, 0, 1, 1], [], []>} : vector<16x384xbf16>, vector<384x128xbf16>, vector<16x128xf32> -> vector<16x128xf32>
    %7 = arith.addf %3, %6 : vector<16x128xf32>
    %c0_6 = arith.constant 0 : index
    %c0_7 = arith.constant 0 : index
    %8 = vector.load %arg9[%c0_6, %c0_7] : memref<16x128xf32, #tpu.memory_space<vmem>>, vector<16x128xf32>
    tpu.vector_store %arg9[%c0_6, %c0_7], %7 {strides = array<i32>} : memref<16x128xf32, #tpu.memory_space<vmem>>, vector<16x128xf32>,
    %c0_8 = arith.constant 0 : index
    %c0_9 = arith.constant 0 : index
    %9 = vector.load %arg9[%c0_8, %c0_9] : memref<16x128xf32, #tpu.memory_space<vmem>>, vector<16x128xf32>
    %c0_10 = arith.constant 0 : index
    %c0_11 = arith.constant 0 : index
    %10 = vector.load %arg5[%c0_10, %c0_11] : memref<16x384xbf16, #tpu.memory_space<vmem>>, vector<16x384xbf16>
    %c0_12 = arith.constant 0 : index
    %c0_13 = arith.constant 0 : index
    %11 = vector.load %arg6[%c0_12, %c0_13] : memref<384x128xbf16, #tpu.memory_space<vmem>>, vector<384x128xbf16>
    %cst_14 = arith.constant dense<0.000000e+00> : vector<16x128xf32>
    %12 = tpu.matmul %10, %11, %cst_14 {dimension_numbers = #tpu.dot_dimension_numbers<[1], [0], [0], [1], [0, 0, 1, 1], [], []>} : vector<16x384xbf16>, vector<384x128xbf16>, vector<16x128xf32> -> vector<16x128xf32>
    %13 = arith.addf %9, %12 : vector<16x128xf32>
    %c0_15 = arith.constant 0 : index
    %c0_16 = arith.constant 0 : index
    %14 = vector.load %arg9[%c0_15, %c0_16] : memref<16x128xf32, #tpu.memory_space<vmem>>, vector<16x128xf32>
    tpu.vector_store %arg9[%c0_15, %c0_16], %13 {strides = array<i32>} : memref<16x128xf32, #tpu.memory_space<vmem>>, vector<16x128xf32>,
    %c0_i32_17 = arith.constant 0 : i32
    %15 = arith.cmpi eq, %arg2, %c0_i32_17 : i32
    %16 = arith.extui %15 : i1 to i32
    %c0_i32_18 = arith.constant 0 : i32
    %17 = arith.cmpi ne, %16, %c0_i32_18 : i32
    scf.if %17 {
      %c0_19 = arith.constant 0 : index
      %c0_20 = arith.constant 0 : index
      %18 = vector.load %arg9[%c0_19, %c0_20] : memref<16x128xf32, #tpu.memory_space<vmem>>, vector<16x128xf32>
      %c0_21 = arith.constant 0 : index
      %c0_22 = arith.constant 0 : index
      %19 = vector.load %arg7[%c0_21, %c0_22] : memref<1x128xf32, #tpu.memory_space<vmem>>, vector<1x128xf32>
      %20 = vector.broadcast %19 : vector<1x128xf32> to vector<16x128xf32>
      %21 = arith.addf %18, %20 : vector<16x128xf32>
      %c0_23 = arith.constant 0 : index
      %c0_24 = arith.constant 0 : index
      %22 = vector.load %arg8[%c0_23, %c0_24] : memref<16x128xf32, #tpu.memory_space<vmem>>, vector<16x128xf32>
      tpu.vector_store %arg8[%c0_23, %c0_24], %21 {strides = array<i32>} : memref<16x128xf32, #tpu.memory_space<vmem>>, vector<16x128xf32>,
    } else {
    }
    return
  }
  func.func @transform_0(%arg0: i32, %arg1: i32, %arg2: i32) -> (i32, i32) {
    %c0_i32 = arith.constant 0 : i32
    return %arg0, %arg2 : i32, i32
  }
  func.func @transform_1(%arg0: i32, %arg1: i32, %arg2: i32) -> (i32, i32) {
    %c0_i32 = arith.constant 0 : i32
    return %arg2, %arg1 : i32, i32
  }
  func.func @transform_2(%arg0: i32, %arg1: i32, %arg2: i32) -> (i32, i32) {
    %c0_i32 = arith.constant 0 : i32
    return %arg0, %arg2 : i32, i32
  }
  func.func @transform_3(%arg0: i32, %arg1: i32, %arg2: i32) -> (i32, i32) {
    %c0_i32 = arith.constant 0 : i32
    return %arg2, %arg1 : i32, i32
  }
  func.func @transform_4(%arg0: i32, %arg1: i32, %arg2: i32) -> (i32, i32) {
    %c0_i32 = arith.constant 0 : i32
    %c0_i32_0 = arith.constant 0 : i32
    return %c0_i32, %arg1 : i32, i32
  }
  func.func @transform_5(%arg0: i32, %arg1: i32, %arg2: i32) -> (i32, i32) {
    %c0_i32 = arith.constant 0 : i32
    return %arg0, %arg1 : i32, i32
  }
}

module attributes {stable_mosaic.version = 11 : i64} {
  func.func @_mm_bias_kernel(%arg0: i32, %arg1: i32, %arg2: i32, %arg3: memref<16x128xf32, #tpu.memory_space<vmem>>, %arg4: memref<128x256xf32, #tpu.memory_space<vmem>>, %arg5: memref<1x256xf32, #tpu.memory_space<vmem>>, %arg6: memref<16x256xf32, #tpu.memory_space<vmem>>, %arg7: memref<16x256xf32, #tpu.memory_space<vmem>>) attributes {dimension_semantics = [#tpu.dimension_semantics<parallel>, #tpu.dimension_semantics<parallel>, #tpu.dimension_semantics<arbitrary>], iteration_bounds = array<i64: 1, 1, 1>, scalar_prefetch = 0 : i64, scratch_operands = 1 : i64, tpu.core_type = #tpu.core_type<tc>, window_params = [{transform_indices = @transform_0, window_bounds = array<i64: 16, 128>}, {transform_indices = @transform_1, window_bounds = array<i64: 128, 256>}, {transform_indices = @transform_2, window_bounds = array<i64: 1, 256>}, {transform_indices = @transform_3, window_bounds = array<i64: 16, 256>}]} {
    %c0_i32 = arith.constant 0 : i32
    %0 = arith.cmpi eq, %arg2, %c0_i32 : i32
    %1 = arith.extui %0 : i1 to i32
    %c0_i32_0 = arith.constant 0 : i32
    %2 = arith.cmpi ne, %1, %c0_i32_0 : i32
    scf.if %2 {
      %cst_10 = arith.constant 0.000000e+00 : f32
      %12 = vector.broadcast %cst_10 : f32 to vector<16x256xf32>
      %c0_11 = arith.constant 0 : index
      %c0_12 = arith.constant 0 : index
      %13 = vector.load %arg7[%c0_11, %c0_12] : memref<16x256xf32, #tpu.memory_space<vmem>>, vector<16x256xf32>
      tpu.vector_store %arg7[%c0_11, %c0_12], %12 {strides = array<i32>} : memref<16x256xf32, #tpu.memory_space<vmem>>, vector<16x256xf32>,
    } else {
    }
    %c0 = arith.constant 0 : index
    %c0_1 = arith.constant 0 : index
    %3 = vector.load %arg7[%c0, %c0_1] : memref<16x256xf32, #tpu.memory_space<vmem>>, vector<16x256xf32>
    %c0_2 = arith.constant 0 : index
    %c0_3 = arith.constant 0 : index
    %4 = vector.load %arg3[%c0_2, %c0_3] : memref<16x128xf32, #tpu.memory_space<vmem>>, vector<16x128xf32>
    %c0_4 = arith.constant 0 : index
    %c0_5 = arith.constant 0 : index
    %5 = vector.load %arg4[%c0_4, %c0_5] : memref<128x256xf32, #tpu.memory_space<vmem>>, vector<128x256xf32>
    %cst = arith.constant dense<0.000000e+00> : vector<16x256xf32>
    %6 = tpu.matmul %4, %5, %cst {dimension_numbers = #tpu.dot_dimension_numbers<[1], [0], [0], [1], [0, 0, 1, 1], [], []>} : vector<16x128xf32>, vector<128x256xf32>, vector<16x256xf32> -> vector<16x256xf32>
    %7 = arith.addf %3, %6 : vector<16x256xf32>
    %c0_6 = arith.constant 0 : index
    %c0_7 = arith.constant 0 : index
    %8 = vector.load %arg7[%c0_6, %c0_7] : memref<16x256xf32, #tpu.memory_space<vmem>>, vector<16x256xf32>
    tpu.vector_store %arg7[%c0_6, %c0_7], %7 {strides = array<i32>} : memref<16x256xf32, #tpu.memory_space<vmem>>, vector<16x256xf32>,
    %c0_i32_8 = arith.constant 0 : i32
    %9 = arith.cmpi eq, %arg2, %c0_i32_8 : i32
    %10 = arith.extui %9 : i1 to i32
    %c0_i32_9 = arith.constant 0 : i32
    %11 = arith.cmpi ne, %10, %c0_i32_9 : i32
    scf.if %11 {
      %c0_10 = arith.constant 0 : index
      %c0_11 = arith.constant 0 : index
      %12 = vector.load %arg7[%c0_10, %c0_11] : memref<16x256xf32, #tpu.memory_space<vmem>>, vector<16x256xf32>
      %c0_12 = arith.constant 0 : index
      %c0_13 = arith.constant 0 : index
      %13 = vector.load %arg5[%c0_12, %c0_13] : memref<1x256xf32, #tpu.memory_space<vmem>>, vector<1x256xf32>
      %14 = vector.broadcast %13 : vector<1x256xf32> to vector<16x256xf32>
      %15 = arith.addf %12, %14 : vector<16x256xf32>
      %c0_14 = arith.constant 0 : index
      %c0_15 = arith.constant 0 : index
      %16 = vector.load %arg6[%c0_14, %c0_15] : memref<16x256xf32, #tpu.memory_space<vmem>>, vector<16x256xf32>
      tpu.vector_store %arg6[%c0_14, %c0_15], %15 {strides = array<i32>} : memref<16x256xf32, #tpu.memory_space<vmem>>, vector<16x256xf32>,
    } else {
    }
    return
  }
  func.func @transform_0(%arg0: i32, %arg1: i32, %arg2: i32) -> (i32, i32) {
    %c0_i32 = arith.constant 0 : i32
    return %arg0, %arg2 : i32, i32
  }
  func.func @transform_1(%arg0: i32, %arg1: i32, %arg2: i32) -> (i32, i32) {
    %c0_i32 = arith.constant 0 : i32
    return %arg2, %arg1 : i32, i32
  }
  func.func @transform_2(%arg0: i32, %arg1: i32, %arg2: i32) -> (i32, i32) {
    %c0_i32 = arith.constant 0 : i32
    %c0_i32_0 = arith.constant 0 : i32
    return %c0_i32, %arg1 : i32, i32
  }
  func.func @transform_3(%arg0: i32, %arg1: i32, %arg2: i32) -> (i32, i32) {
    %c0_i32 = arith.constant 0 : i32
    return %arg0, %arg1 : i32, i32
  }
}

</mosaic_0001>

<bundles_post_ra>
// kernel: deeplab_v2_forward.5
= control target key start
LH: loop header
LB: loop body
LE: loop exit
PB: predicated region body
PF: predicated region fallthrough
CT: control target
= control target key end

     0   :  { %s602_s1 = inlined_call_operand.vmem [shape: bf16[128,128], index: 1, kind: input, shape index: {}]   ;;  %s603_s0 = inlined_call_operand.vmem [shape: bf16[128,128], index: 0, kind: input, shape index: {}]   ;;  %s604_s2 = inlined_call_operand.vmem [shape: f32[1,128], index: 2, kind: input, shape index: {}]   ;;  %s605_s3 = inlined_call_operand.vmem [shape: f32[128,128], index: 3, kind: output, shape index: {}]  }
   0x1   :  { %v467_v0 = vld [vmem:[%s602_s1] sm:$0xff]   ;;  %v468_v1 = vld [vmem:[%s602_s1 + $0x8] sm:$0xff]   ;;  %v469_v2 = vld [vmem:[%s602_s1 + $0x10] sm:$0xff]  }
   0x2   :  { %419 = vmatprep.subr.bf16.mxu0 %v467_v0  ;;  %451 = vmatprep.subr.bf16.mxu1 %v467_v0  ;;  %v470_v3 = vld [vmem:[%s602_s1 + $0x18] sm:$0xff]   ;;  %v475_v4 = vld [vmem:[%s603_s0] sm:$0xff]   ;;  %v472_v7 = vld [vmem:[%s602_s1 + $0x28] sm:$0xff]  }
   0x3   :  { %420 = vmatpush3.bf16.msra.mxu0 %v467_v0  ;;  %459 = vmatpush3.bf16.msra.mxu1 %v467_v0  ;;  %v476_v5 = vld [vmem:[%s603_s0 + $0x20] sm:$0xff]   ;;  %v473_v8 = vld [vmem:[%s602_s1 + $0x30] sm:$0xff]   ;;  %v474_v9 = vld [vmem:[%s602_s1 + $0x38] sm:$0xff]  }
   0x4   :  { %421 = vmatprep.subr.bf16.mxu0 %v468_v1  ;;  %452 = vmatprep.subr.bf16.mxu1 %v468_v1  ;;  %v471_v6 = vld [vmem:[%s602_s1 + $0x20] sm:$0xff]   ;;  %v477_v10 = vld [vmem:[%s603_s0 + $0x8] sm:$0xff]   ;;  %v479_v12 = vld [vmem:[%s603_s0 + $0x10] sm:$0xff]  }
   0x5   :  { %435 = vmatprep.mubr.bf16.mxu0 %v475_v4  ;;  %443 = vmatprep.mubr.bf16.mxu1 %v476_v5  ;;  %v478_v11 = vld [vmem:[%s603_s0 + $0x28] sm:$0xff]   ;;  %v480_v13 = vld [vmem:[%s603_s0 + $0x30] sm:$0xff]   ;;  %v481_v14 = vld [vmem:[%s603_s0 + $0x18] sm:$0xff]  }
   0x6   :  { %v482_v15 = vld [vmem:[%s603_s0 + $0x38] sm:$0xff]   ;;  %v402_v16 = vld [vmem:[%s604_s2] ss:$0 sm:$0xff] }
   0x7   :  { %422 = vmatpush3.bf16.msra.mxu0 %v468_v1  ;;  %460 = vmatpush3.bf16.msra.mxu1 %v468_v1 }
   0x8   :  { %423 = vmatprep.subr.bf16.mxu0 %v469_v2  ;;  %453 = vmatprep.subr.bf16.mxu1 %v469_v2 }
   0xb   :  { %424 = vmatpush3.bf16.msra.mxu0 %v469_v2  ;;  %461 = vmatpush3.bf16.msra.mxu1 %v469_v2 }
   0xc   :  { %425 = vmatprep.subr.bf16.mxu0 %v470_v3  ;;  %454 = vmatprep.subr.bf16.mxu1 %v470_v3 }
   0xf   :  { %426 = vmatpush3.bf16.msra.mxu0 %v470_v3  ;;  %462 = vmatpush3.bf16.msra.mxu1 %v470_v3 }
  0x10   :  { %427 = vmatprep.subr.bf16.mxu0 %v471_v6  ;;  %455 = vmatprep.subr.bf16.mxu1 %v471_v6 }
  0x13   :  { %428 = vmatpush3.bf16.msra.mxu0 %v471_v6  ;;  %463 = vmatpush3.bf16.msra.mxu1 %v471_v6 }
  0x14   :  { %429 = vmatprep.subr.bf16.mxu0 %v472_v7  ;;  %456 = vmatprep.subr.bf16.mxu1 %v472_v7 }
  0x17   :  { %430 = vmatpush3.bf16.msra.mxu0 %v472_v7  ;;  %464 = vmatpush3.bf16.msra.mxu1 %v472_v7 }
  0x18   :  { %431 = vmatprep.subr.bf16.mxu0 %v473_v8  ;;  %457 = vmatprep.subr.bf16.mxu1 %v473_v8 }
  0x1b   :  { %432 = vmatpush3.bf16.msra.mxu0 %v473_v8  ;;  %465 = vmatpush3.bf16.msra.mxu1 %v473_v8 }
  0x1c   :  { %433 = vmatprep.subr.bf16.mxu0 %v474_v9  ;;  %458 = vmatprep.subr.bf16.mxu1 %v474_v9 }
  0x1f   :  { %434 = vmatpush3.bf16.msra.mxu0 %v474_v9  ;;  %466 = vmatpush3.bf16.msra.mxu1 %v474_v9 }
  0x22   :  { %436 = vmatmul.mubr.bf16.vlgmr.msra.gmra.mrb[0].mxu0 %v477_v10  ;;  %444 = vmatmul.mubr.bf16.vlgmr.msra.gmra.mrb[0].mxu1 %v478_v11 }
  0x23   :  { %439 = vmatprep.mubr.bf16.mxu0 %v479_v12  ;;  %447 = vmatprep.mubr.bf16.mxu1 %v480_v13 }
  0x2a   :  { %440 = vmatmul.mubr.bf16.gmra.mrb[4].mxu0 %v481_v14  ;;  %448 = vmatmul.mubr.bf16.gmra.mrb[4].mxu1 %v482_v15 }
  0xf5   :  { %v437_v17 = vpop.f32.mrb[0].mxu0  ;;  %v445_v18 = vpop.f32.mrb[0].mxu1 }
  0xf6   :  { %v336_v19 = vadd.f32 %v437_v17, %v402_v16  ;;  %v344_v20 = vadd.f32 %v445_v18, %v402_v16  ;;  %v213_v21 = vpop.f32.mrb[1].mxu0  ;;  %v245_v22 = vpop.f32.mrb[1].mxu1 }
  0xf7   :  { %v334_v23 = vadd.f32 %v402_v16, %v213_v21  ;;  %v342_v24 = vadd.f32 %v402_v16, %v245_v22  ;;  %v438_v25 = vpop.f32.mrb[2].mxu0  ;;  %v446_v26 = vpop.f32.mrb[2].mxu1 }
  0xf8   :  { %v352_v27 = vmax.f32 %v336_v19, 0.0  ;;  %v360_v28 = vmax.f32 %v344_v20, 0.0  ;;  %v337_v29 = vadd.f32 %v438_v25, %v402_v16  ;;  %v345_v30 = vadd.f32 %v446_v26, %v402_v16  ;;  %v216_v31 = vpop.f32.mrb[3].mxu0  ;;  %v248_v32 = vpop.f32.mrb[3].mxu1 }
  0xf9   :  { %v350_v33 = vmax.f32 %v334_v23, 0.0  ;;  %v358_v34 = vmax.f32 %v342_v24, 0.0  ;;  %v335_v35 = vadd.f32 %v402_v16, %v216_v31  ;;  %v343_v36 = vadd.f32 %v402_v16, %v248_v32 }
  0xfa   :  { %368 = vst [vmem:[%s605_s3 + $0x10] sm:$0xff] %v352_v27  ;;  %376 = vst [vmem:[%s605_s3 + $0x50] sm:$0xff] %v360_v28  ;;  %v353_v37 = vmax.f32 %v337_v29, 0.0  ;;  %v361_v38 = vmax.f32 %v345_v30, 0.0 }
  0xfb   :  { %366 = vst [vmem:[%s605_s3] sm:$0xff] %v350_v33  ;;  %374 = vst [vmem:[%s605_s3 + $0x40] sm:$0xff] %v358_v34  ;;  %v351_v39 = vmax.f32 %v335_v35, 0.0  ;;  %v359_v40 = vmax.f32 %v343_v36, 0.0 }
  0xfc   :  { %369 = vst [vmem:[%s605_s3 + $0x18] sm:$0xff] %v353_v37  ;;  %377 = vst [vmem:[%s605_s3 + $0x58] sm:$0xff] %v361_v38 }
  0xfd   :  { %367 = vst [vmem:[%s605_s3 + $0x8] sm:$0xff] %v351_v39  ;;  %375 = vst [vmem:[%s605_s3 + $0x48] sm:$0xff] %v359_v40  ;;  %v441_v41 = vpop.f32.mrb[4].mxu0  ;;  %v449_v42 = vpop.f32.mrb[4].mxu1 }
  0xfe   :  { %v340_v43 = vadd.f32 %v441_v41, %v402_v16  ;;  %v348_v44 = vadd.f32 %v449_v42, %v402_v16  ;;  %v229_v45 = vpop.f32.mrb[5].mxu0  ;;  %v261_v46 = vpop.f32.mrb[5].mxu1 }
  0xff   :  { %v338_v47 = vadd.f32 %v402_v16, %v229_v45  ;;  %v346_v48 = vadd.f32 %v402_v16, %v261_v46  ;;  %v442_v49 = vpop.f32.mrb[6].mxu0  ;;  %v450_v50 = vpop.f32.mrb[6].mxu1 }
 0x100   :  { %v356_v51 = vmax.f32 %v340_v43, 0.0  ;;  %v364_v52 = vmax.f32 %v348_v44, 0.0  ;;  %v341_v53 = vadd.f32 %v442_v49, %v402_v16  ;;  %v349_v54 = vadd.f32 %v450_v50, %v402_v16  ;;  %v232_v55 = vpop.f32.mrb[7].mxu0  ;;  %v264_v56 = vpop.f32.mrb[7].mxu1 }
 0x101   :  { %v354_v57 = vmax.f32 %v338_v47, 0.0  ;;  %v362_v58 = vmax.f32 %v346_v48, 0.0  ;;  %v339_v59 = vadd.f32 %v402_v16, %v232_v55  ;;  %v347_v60 = vadd.f32 %v402_v16, %v264_v56 }
 0x102   :  { %372 = vst [vmem:[%s605_s3 + $0x30] sm:$0xff] %v356_v51  ;;  %380 = vst [vmem:[%s605_s3 + $0x70] sm:$0xff] %v364_v52  ;;  %v357_v61 = vmax.f32 %v341_v53, 0.0  ;;  %v365_v62 = vmax.f32 %v349_v54, 0.0 }
 0x103   :  { %370 = vst [vmem:[%s605_s3 + $0x20] sm:$0xff] %v354_v57  ;;  %378 = vst [vmem:[%s605_s3 + $0x60] sm:$0xff] %v362_v58  ;;  %v355_v63 = vmax.f32 %v339_v59, 0.0  ;;  %v363_v0 = vmax.f32 %v347_v60, 0.0 }
 0x104   :  { %373 = vst [vmem:[%s605_s3 + $0x38] sm:$0xff] %v357_v61  ;;  %381 = vst [vmem:[%s605_s3 + $0x78] sm:$0xff] %v365_v62 }
 0x105   :  { %371 = vst [vmem:[%s605_s3 + $0x28] sm:$0xff] %v355_v63  ;;  %379 = vst [vmem:[%s605_s3 + $0x68] sm:$0xff] %v363_v0 }

// kernel: deeplab_v2_forward.6
= control target key start
LH: loop header
LB: loop body
LE: loop exit
PB: predicated region body
PF: predicated region fallthrough
CT: control target
= control target key end

     0   :  { %s310_s1 = inlined_call_operand.vmem [shape: bf16[128,128], index: 1, kind: input, shape index: {}]   ;;  %s311_s0 = inlined_call_operand.vmem [shape: bf16[32,128], index: 0, kind: input, shape index: {}]   ;;  %s312_s2 = inlined_call_operand.vmem [shape: f32[1,128], index: 2, kind: input, shape index: {}]   ;;  %s313_s3 = inlined_call_operand.vmem [shape: f32[32,128], index: 3, kind: output, shape index: {}]  }
   0x1   :  { %v235_v0 = vld [vmem:[%s310_s1] sm:$0xff]   ;;  %v236_v1 = vld [vmem:[%s310_s1 + $0x8] sm:$0xff]   ;;  %v237_v2 = vld [vmem:[%s310_s1 + $0x10] sm:$0xff]  }
   0x2   :  { %215 = vmatprep.subr.bf16.mxu0 %v235_v0  ;;  %v238_v3 = vld [vmem:[%s310_s1 + $0x18] sm:$0xff]   ;;  %v243_v4 = vld [vmem:[%s311_s0] sm:$0xff]   ;;  %v240_v6 = vld [vmem:[%s310_s1 + $0x28] sm:$0xff]  }
   0x3   :  { %216 = vmatpush3.bf16.msra.mxu0 %v235_v0  ;;  %231 = vmatprep.mubr.bf16.mxu0 %v243_v4  ;;  %v239_v5 = vld [vmem:[%s310_s1 + $0x20] sm:$0xff]   ;;  %v241_v7 = vld [vmem:[%s310_s1 + $0x30] sm:$0xff]   ;;  %v242_v8 = vld [vmem:[%s310_s1 + $0x38] sm:$0xff]  }
   0x4   :  { %217 = vmatprep.subr.bf16.mxu0 %v236_v1  ;;  %v244_v9 = vld [vmem:[%s311_s0 + $0x8] sm:$0xff]   ;;  %v204_v10 = vld [vmem:[%s312_s2] ss:$0 sm:$0xff] }
   0x7   :  { %218 = vmatpush3.bf16.msra.mxu0 %v236_v1 }
   0x8   :  { %219 = vmatprep.subr.bf16.mxu0 %v237_v2 }
   0xb   :  { %220 = vmatpush3.bf16.msra.mxu0 %v237_v2 }
   0xc   :  { %221 = vmatprep.subr.bf16.mxu0 %v238_v3 }
   0xf   :  { %222 = vmatpush3.bf16.msra.mxu0 %v238_v3 }
  0x10   :  { %223 = vmatprep.subr.bf16.mxu0 %v239_v5 }
  0x13   :  { %224 = vmatpush3.bf16.msra.mxu0 %v239_v5 }
  0x14   :  { %225 = vmatprep.subr.bf16.mxu0 %v240_v6 }
  0x17   :  { %226 = vmatpush3.bf16.msra.mxu0 %v240_v6 }
  0x18   :  { %227 = vmatprep.subr.bf16.mxu0 %v241_v7 }
  0x1b   :  { %228 = vmatpush3.bf16.msra.mxu0 %v241_v7 }
  0x1c   :  { %229 = vmatprep.subr.bf16.mxu0 %v242_v8 }
  0x1f   :  { %230 = vmatpush3.bf16.msra.mxu0 %v242_v8 }
  0x22   :  { %232 = vmatmul.mubr.bf16.vlgmr.msra.gmra.mrb[0].mxu0 %v244_v9 }
  0xf5   :  { %v233_v11 = vpop.f32.mrb[0].mxu0 }
  0xf6   :  { %v180_v12 = vadd.f32 %v233_v11, %v204_v10  ;;  %v141_v13 = vpop.f32.mrb[1].mxu0 }
  0xf7   :  { %v178_v14 = vadd.f32 %v204_v10, %v141_v13  ;;  %v234_v15 = vpop.f32.mrb[2].mxu0 }
  0xf8   :  { %v184_v16 = vmax.f32 %v180_v12, 0.0  ;;  %v181_v17 = vadd.f32 %v234_v15, %v204_v10  ;;  %v144_v18 = vpop.f32.mrb[3].mxu0 }
  0xf9   :  { %v182_v19 = vmax.f32 %v178_v14, 0.0  ;;  %v179_v20 = vadd.f32 %v204_v10, %v144_v18 }
  0xfa   :  { %188 = vst [vmem:[%s313_s3 + $0x10] sm:$0xff] %v184_v16  ;;  %v185_v21 = vmax.f32 %v181_v17, 0.0 }
  0xfb   :  { %186 = vst [vmem:[%s313_s3] sm:$0xff] %v182_v19  ;;  %v183_v22 = vmax.f32 %v179_v20, 0.0 }
  0xfc   :  { %189 = vst [vmem:[%s313_s3 + $0x18] sm:$0xff] %v185_v21 }
  0xfd   :  { %187 = vst [vmem:[%s313_s3 + $0x8] sm:$0xff] %v183_v22 }

// kernel: deeplab_v2_forward.7
= control target key start
LH: loop header
LB: loop body
LE: loop exit
PB: predicated region body
PF: predicated region fallthrough
CT: control target
= control target key end

     0   :  { %s373_s1 = inlined_call_operand.vmem [shape: bf16[256,128], index: 1, kind: input, shape index: {}]   ;;  %s374_s0 = inlined_call_operand.vmem [shape: bf16[16,256], index: 0, kind: input, shape index: {}]   ;;  %s375_s2 = inlined_call_operand.vmem [shape: f32[1,128], index: 2, kind: input, shape index: {}]   ;;  %s376_s3 = inlined_call_operand.vmem [shape: f32[16,128], index: 3, kind: output, shape index: {}]  }
   0x1   :  { %v271_v0 = vld [vmem:[%s373_s1 + $0x40] sm:$0xff]   ;;  %v273_v2 = vld [vmem:[%s373_s1 + $0x48] sm:$0xff]   ;;  %v275_v4 = vld [vmem:[%s373_s1 + $0x50] sm:$0xff]  }
   0x2   :  { %v272_v1 = vld [vmem:[%s373_s1] sm:$0xff]   ;;  %249 = vmatprep.subr.bf16.mxu0 %v271_v0  ;;  %v274_v3 = vld [vmem:[%s373_s1 + $0x8] sm:$0xff]   ;;  %v276_v5 = vld [vmem:[%s373_s1 + $0x10] sm:$0xff]  }
   0x3   :  { %250 = vmatpush3.bf16.msra.mxu0 %v272_v1  ;;  %v277_v6 = vld [vmem:[%s373_s1 + $0x58] sm:$0xff]   ;;  %v279_v8 = vld [vmem:[%s373_s1 + $0x60] sm:$0xff]   ;;  %v281_v10 = vld [vmem:[%s373_s1 + $0x68] sm:$0xff]  }
   0x4   :  { %251 = vmatprep.subr.bf16.mxu0 %v273_v2  ;;  %v278_v7 = vld [vmem:[%s373_s1 + $0x18] sm:$0xff]   ;;  %v280_v9 = vld [vmem:[%s373_s1 + $0x20] sm:$0xff]   ;;  %v282_v12 = vld [vmem:[%s373_s1 + $0x28] sm:$0xff]  }
   0x5   :  { %v289_v11 = vld [vmem:[%s374_s0 + $0x4] ss:$8 sps:$4 sm:$0xff]   ;;  %v283_v13 = vld [vmem:[%s373_s1 + $0x70] sm:$0xff]   ;;  %v285_v15 = vld [vmem:[%s373_s1 + $0x78] sm:$0xff]  }
   0x6   :  { %195 = vmatprep.mubr.bf16.mxu0 %v289_v11  ;;  %v284_v14 = vld [vmem:[%s373_s1 + $0x30] sm:$0xff]   ;;  %v286_v16 = vld [vmem:[%s373_s1 + $0x38] sm:$0xff]   ;;  %v287_v17 = vld [vmem:[%s374_s0] ss:$8 sps:$4 sm:$0xff]  }
   0x7   :  { %252 = vmatpush3.bf16.msra.mxu0 %v274_v3  ;;  %v248_v20 = vld [vmem:[%s375_s2] ss:$0 sm:$0xff] }
   0x8   :  { %253 = vmatprep.subr.bf16.mxu0 %v275_v4 }
   0xb   :  { %254 = vmatpush3.bf16.msra.mxu0 %v276_v5 }
   0xc   :  { %255 = vmatprep.subr.bf16.mxu0 %v277_v6 }
   0xf   :  { %256 = vmatpush3.bf16.msra.mxu0 %v278_v7 }
  0x10   :  { %257 = vmatprep.subr.bf16.mxu0 %v279_v8 }
  0x13   :  { %258 = vmatpush3.bf16.msra.mxu0 %v280_v9 }
  0x14   :  { %259 = vmatprep.subr.bf16.mxu0 %v281_v10 }
  0x17   :  { %260 = vmatpush3.bf16.msra.mxu0 %v282_v12 }
  0x18   :  { %261 = vmatprep.subr.bf16.mxu0 %v283_v13 }
  0x1b   :  { %262 = vmatpush3.bf16.msra.mxu0 %v284_v14 }
  0x1c   :  { %263 = vmatprep.subr.bf16.mxu0 %v285_v15 }
  0x1f   :  { %264 = vmatpush3.bf16.msra.mxu0 %v286_v16 }
  0x22   :  { %196 = vmatmul.mubr.bf16.vlgmr.msra.gmra.mrb[0].mxu0 %v287_v17 }
  0xf5   :  { %v265_v18 = vpop.f32.mrb[0].mxu0 }
  0xf6   :  { %v266_v19 = vpop.f32.mrb[1].mxu0 }
  0xf7   :  { %v267_v21 = vadd.f32 %v266_v19, %v265_v18  ;;  %v268_v22 = vpop.f32.mrb[2].mxu0 }
  0xf8   :  { %v269_v23 = vpop.f32.mrb[3].mxu0 }
  0xf9   :  { %v220_v24 = vadd.f32 %v267_v21, %v248_v20  ;;  %v270_v25 = vadd.f32 %v269_v23, %v268_v22 }
  0xfb   :  { %v222_v26 = vmax.f32 %v220_v24, 0.0  ;;  %v221_v27 = vadd.f32 %v270_v25, %v248_v20 }
  0xfd   :  { %224 = vst [vmem:[%s376_s3] sm:$0xff] %v222_v26  ;;  %v223_v28 = vmax.f32 %v221_v27, 0.0 }
  0xff   :  { %225 = vst [vmem:[%s376_s3 + $0x8] sm:$0xff] %v223_v28 }

// kernel: deeplab_v2_forward.9
= control target key start
LH: loop header
LB: loop body
LE: loop exit
PB: predicated region body
PF: predicated region fallthrough
CT: control target
= control target key end

     0   :  { %v225_v3 = vmov 0.0   ;;  %v154_v51 = vlaneseq  ;;  %s363_s1 = inlined_call_operand.vmem [shape: f32[128,256], index: 1, kind: input, shape index: {}]   ;;  %s364_s0 = inlined_call_operand.vmem [shape: f32[16,128], index: 0, kind: input, shape index: {}]   ;;  %s365_s2 = inlined_call_operand.vmem [shape: f32[1,256], index: 2, kind: input, shape index: {}]   ;;  %s366_s3 = inlined_call_operand.vmem [shape: f32[16,256], index: 3, kind: output, shape index: {}]  }
   0x1   :  { %v29_v0 = vld [vmem:[%s363_s1 + $0x8] sm:$0xff]  ;;  %v31_v1 = vld [vmem:[%s363_s1 + $0x18] sm:$0xff]  ;;  %v28_v2 = vld [vmem:[%s363_s1] sm:$0xff]  ;;  %124 = vmatprep.mubr.f32.mxu0 %v225_v3  ;;  %130 = vmatprep.mubr.f32.mxu1 %v225_v3 }
   0x2   :  { %v176_v4 = vpack.c.bf16 %v31_v1, %v29_v0  ;;  %v30_v5 = vld [vmem:[%s363_s1 + $0x10] sm:$0xff]  ;;  %v33_v6 = vld [vmem:[%s363_s1 + $0x28] sm:$0xff]  ;;  %v35_v7 = vld [vmem:[%s363_s1 + $0x38] sm:$0xff]  ;;  %v155_v52 = vshrl.u32 %v154_v51, 7 }
   0x3   :  { %v178_v8 = vpack.c.bf16 %v30_v5, %v28_v2  ;;  %v180_v9 = vpack.c.bf16 %v35_v7, %v33_v6  ;;  %v32_v10 = vld [vmem:[%s363_s1 + $0x20] sm:$0xff]  ;;  %v34_v11 = vld [vmem:[%s363_s1 + $0x30] sm:$0xff]  ;;  %v37_v12 = vld [vmem:[%s363_s1 + $0x48] sm:$0xff] }
   0x4   :  { %177 = vmatprep.subr.bf16.mxu0 %v176_v4  ;;  %208 = vmatprep.subr.bf16.mxu1 %v176_v4  ;;  %v39_v13 = vld [vmem:[%s363_s1 + $0x58] sm:$0xff]  ;;  %v182_v14 = vpack.c.bf16 %v34_v11, %v32_v10  ;;  %v36_v16 = vld [vmem:[%s363_s1 + $0x40] sm:$0xff]  ;;  %v38_v17 = vld [vmem:[%s363_s1 + $0x50] sm:$0xff]  ;;  %v156_v53 = vsub.s32 0, %v155_v52  ;;  %v160_v55 = vsub.s32 1, %v155_v52 }
   0x5   :  { %179 = vmatpush1.bf16.msra.mxu0 %v178_v8  ;;  %216 = vmatpush1.bf16.msra.mxu1 %v178_v8  ;;  %v184_v15 = vpack.c.bf16 %v39_v13, %v37_v12  ;;  %v41_v18 = vld [vmem:[%s363_s1 + $0x68] sm:$0xff]  ;;  %v43_v19 = vld [vmem:[%s363_s1 + $0x78] sm:$0xff]  ;;  %v186_v20 = vpack.c.bf16 %v38_v17, %v36_v16  ;;  %v40_v22 = vld [vmem:[%s363_s1 + $0x60] sm:$0xff] }
   0x6   :  { %181 = vmatprep.subr.bf16.mxu0 %v180_v9  ;;  %209 = vmatprep.subr.bf16.mxu1 %v180_v9  ;;  %v188_v21 = vpack.c.bf16 %v43_v19, %v41_v18  ;;  %v42_v23 = vld [vmem:[%s363_s1 + $0x70] sm:$0xff]  ;;  %v45_v24 = vld [vmem:[%s363_s1 + $0x88] sm:$0xff]  ;;  %v47_v25 = vld [vmem:[%s363_s1 + $0x98] sm:$0xff] }
   0x7   :  { %v190_v26 = vpack.c.bf16 %v42_v23, %v40_v22  ;;  %v192_v27 = vpack.c.bf16 %v47_v25, %v45_v24  ;;  %v44_v28 = vld [vmem:[%s363_s1 + $0x80] sm:$0xff]  ;;  %v46_v29 = vld [vmem:[%s363_s1 + $0x90] sm:$0xff]  ;;  %v49_v30 = vld [vmem:[%s363_s1 + $0xa8] sm:$0xff] }
   0x8   :  { %v51_v31 = vld [vmem:[%s363_s1 + $0xb8] sm:$0xff]  ;;  %v194_v32 = vpack.c.bf16 %v46_v29, %v44_v28  ;;  %v48_v34 = vld [vmem:[%s363_s1 + $0xa0] sm:$0xff]  ;;  %v50_v35 = vld [vmem:[%s363_s1 + $0xb0] sm:$0xff] }
   0x9   :  { %183 = vmatpush1.bf16.msra.mxu0 %v182_v14  ;;  %217 = vmatpush1.bf16.msra.mxu1 %v182_v14  ;;  %v196_v33 = vpack.c.bf16 %v51_v31, %v49_v30  ;;  %v53_v36 = vld [vmem:[%s363_s1 + $0xc8] sm:$0xff]  ;;  %v55_v37 = vld [vmem:[%s363_s1 + $0xd8] sm:$0xff]  ;;  %v198_v38 = vpack.c.bf16 %v50_v35, %v48_v34  ;;  %v52_v40 = vld [vmem:[%s363_s1 + $0xc0] sm:$0xff] }
   0xa   :  { %185 = vmatprep.subr.bf16.mxu0 %v184_v15  ;;  %210 = vmatprep.subr.bf16.mxu1 %v184_v15  ;;  %v200_v39 = vpack.c.bf16 %v55_v37, %v53_v36  ;;  %v54_v41 = vld [vmem:[%s363_s1 + $0xd0] sm:$0xff]  ;;  %v57_v42 = vld [vmem:[%s363_s1 + $0xe8] sm:$0xff]  ;;  %v59_v43 = vld [vmem:[%s363_s1 + $0xf8] sm:$0xff] }
   0xb   :  { %v202_v44 = vpack.c.bf16 %v54_v41, %v52_v40  ;;  %v204_v45 = vpack.c.bf16 %v59_v43, %v57_v42  ;;  %v56_v46 = vld [vmem:[%s363_s1 + $0xe0] sm:$0xff]  ;;  %v58_v47 = vld [vmem:[%s363_s1 + $0xf0] sm:$0xff]  ;;  %v27_v50 = vld [vmem:[%s364_s0 + $0x8] sm:$0xff] }
   0xc   :  { %v206_v48 = vpack.c.bf16 %v58_v47, %v56_v46  ;;  %v26_v49 = vld [vmem:[%s364_s0] sm:$0xff] }
   0xd   :  { %187 = vmatpush1.bf16.msra.mxu0 %v186_v20  ;;  %218 = vmatpush1.bf16.msra.mxu1 %v186_v20  ;;  %v152_v54 = vld [vmem:[%s365_s2] sm:$0x3] }
   0xe   :  { %189 = vmatprep.subr.bf16.mxu0 %v188_v21  ;;  %211 = vmatprep.subr.bf16.mxu1 %v188_v21  ;;  %v157_v56 = vrot.slane %v152_v54, %v156_v53  ;;  %v161_v57 = vrot.slane %v152_v54, %v160_v55 }
  0x11   :  { %191 = vmatpush1.bf16.msra.mxu0 %v190_v26  ;;  %219 = vmatpush1.bf16.msra.mxu1 %v190_v26 }
  0x12   :  { %193 = vmatprep.subr.bf16.mxu0 %v192_v27  ;;  %212 = vmatprep.subr.bf16.mxu1 %v192_v27 }
  0x15   :  { %195 = vmatpush1.bf16.msra.mxu0 %v194_v32  ;;  %220 = vmatpush1.bf16.msra.mxu1 %v194_v32 }
  0x16   :  { %197 = vmatprep.subr.bf16.mxu0 %v196_v33  ;;  %213 = vmatprep.subr.bf16.mxu1 %v196_v33 }
  0x19   :  { %199 = vmatpush1.bf16.msra.mxu0 %v198_v38  ;;  %221 = vmatpush1.bf16.msra.mxu1 %v198_v38 }
  0x1a   :  { %201 = vmatprep.subr.bf16.mxu0 %v200_v39  ;;  %214 = vmatprep.subr.bf16.mxu1 %v200_v39 }
  0x1d   :  { %203 = vmatpush1.bf16.msra.mxu0 %v202_v44  ;;  %222 = vmatpush1.bf16.msra.mxu1 %v202_v44 }
  0x1e   :  { %205 = vmatprep.subr.bf16.mxu0 %v204_v45  ;;  %215 = vmatprep.subr.bf16.mxu1 %v204_v45 }
  0x21   :  { %207 = vmatpush1.bf16.msra.mxu0 %v206_v48  ;;  %223 = vmatpush1.bf16.msra.mxu1 %v206_v48 }
  0x24   :  { %125 = vmatmul.mubr.f32.vlgmr.msra.gmra.mrb[0].mxu0 %v26_v49  ;;  %131 = vmatmul.mubr.f32.vlgmr.msra.gmra.mrb[0].mxu1 %v27_v50 }
  0xf7   :  { %v126_v58 = vpop.f32.mrb[0].mxu0  ;;  %v132_v59 = vpop.f32.mrb[0].mxu1 }
  0xf8   :  { %v164_v60 = vadd.f32 %v157_v56, %v126_v58  ;;  %v166_v61 = vadd.f32 %v157_v56, %v132_v59  ;;  %v128_v62 = vpop.f32.mrb[1].mxu0  ;;  %v134_v63 = vpop.f32.mrb[1].mxu1 }
  0xf9   :  { %v165_v0 = vadd.f32 %v161_v57, %v128_v62  ;;  %v167_v1 = vadd.f32 %v161_v57, %v134_v63 }
  0xfa   :  { %168 = vst [vmem:[%s366_s3] sm:$0xff] %v164_v60  ;;  %170 = vst [vmem:[%s366_s3 + $0x10] sm:$0xff] %v166_v61 }
  0xfb   :  { %169 = vst [vmem:[%s366_s3 + $0x8] sm:$0xff] %v165_v0  ;;  %171 = vst [vmem:[%s366_s3 + $0x18] sm:$0xff] %v167_v1 }

// kernel: deeplab_v2_forward.8
= control target key start
LH: loop header
LB: loop body
LE: loop exit
PB: predicated region body
PF: predicated region fallthrough
CT: control target
= control target key end

     0   :  { %v862_v1 = vmov 0.0   ;;  %vm863_vm0 = vmmov 0   ;;  %s1085_s1 = inlined_call_operand.vmem [shape: bf16[384,128], index: 1, kind: input, shape index: {}]   ;;  %s1086_s0 = inlined_call_operand.vmem [shape: bf16[16,384], index: 0, kind: input, shape index: {}]   ;;  %s1087_s3 = inlined_call_operand.vmem [shape: bf16[384,128], index: 3, kind: input, shape index: {}]   ;;  %s1088_s2 = inlined_call_operand.vmem [shape: bf16[16,384], index: 2, kind: input, shape index: {}]   ;;  %s1089_s4 = inlined_call_operand.vmem [shape: f32[1,128], index: 4, kind: input, shape index: {}]   ;;  %s1090_s5 = inlined_call_operand.vmem [shape: f32[16,128], index: 5, kind: output, shape index: {}]  }
   0x1   :  { %v806_v0 = vld [vmem:[%s1085_s1 + $0x40] sm:$0xff]   ;;  %764 = vmatprep.subr.bf16.mxu1 %v862_v1  ;;  %780 = vmatprep.mubr.msk.bf16.mxu1 %vm863_vm0, %v862_v1  ;;  %v809_v4 = vld [vmem:[%s1085_s1 + $0x48] sm:$0xff]   ;;  %v812_v7 = vld [vmem:[%s1085_s1 + $0x50] sm:$0xff]  }
   0x2   :  { %v807_v2 = vld [vmem:[%s1085_s1] sm:$0xff]   ;;  %702 = vmatprep.subr.bf16.mxu0 %v806_v0  ;;  %v810_v5 = vld [vmem:[%s1085_s1 + $0x8] sm:$0xff]   ;;  %v813_v8 = vld [vmem:[%s1085_s1 + $0x10] sm:$0xff]  }
   0x3   :  { %v808_v3 = vld [vmem:[%s1085_s1 + $0x80] sm:$0xff]   ;;  %703 = vmatpush3.bf16.msra.mxu0 %v807_v2  ;;  %v811_v6 = vld [vmem:[%s1085_s1 + $0x88] sm:$0xff]   ;;  %v814_v9 = vld [vmem:[%s1085_s1 + $0x90] sm:$0xff]  }
   0x4   :  { %765 = vmatpush3.bf16.msra.mxu1 %v808_v3  ;;  %704 = vmatprep.subr.bf16.mxu0 %v809_v4  ;;  %v815_v10 = vld [vmem:[%s1085_s1 + $0x58] sm:$0xff]   ;;  %v818_v13 = vld [vmem:[%s1085_s1 + $0x60] sm:$0xff]   ;;  %v821_v16 = vld [vmem:[%s1085_s1 + $0x68] sm:$0xff]  }
   0x5   :  { %766 = vmatprep.subr.bf16.mxu1 %v862_v1  ;;  %v816_v11 = vld [vmem:[%s1085_s1 + $0x18] sm:$0xff]   ;;  %v819_v14 = vld [vmem:[%s1085_s1 + $0x20] sm:$0xff]   ;;  %v822_v17 = vld [vmem:[%s1085_s1 + $0x28] sm:$0xff]  }
   0x6   :  { %v817_v12 = vld [vmem:[%s1085_s1 + $0x98] sm:$0xff]   ;;  %v820_v15 = vld [vmem:[%s1085_s1 + $0xa0] sm:$0xff]   ;;  %v823_v18 = vld [vmem:[%s1085_s1 + $0xa8] sm:$0xff]  }
   0x7   :  { %705 = vmatpush3.bf16.msra.mxu0 %v810_v5  ;;  %v824_v19 = vld [vmem:[%s1085_s1 + $0x70] sm:$0xff]   ;;  %v827_v22 = vld [vmem:[%s1085_s1 + $0x78] sm:$0xff]   ;;  %v830_v26 = vld [vmem:[%s1086_s0] ss:$12 sps:$4 sm:$0xff]  }
   0x8   :  { %767 = vmatpush3.bf16.msra.mxu1 %v811_v6  ;;  %706 = vmatprep.subr.bf16.mxu0 %v812_v7  ;;  %v825_v20 = vld [vmem:[%s1085_s1 + $0x30] sm:$0xff]   ;;  %v828_v24 = vld [vmem:[%s1085_s1 + $0x38] sm:$0xff]   ;;  %v833_v27 = vld [vmem:[%s1087_s3 + $0x40] sm:$0xff]  }
   0x9   :  { %768 = vmatprep.subr.bf16.mxu1 %v862_v1  ;;  %v826_v21 = vld [vmem:[%s1085_s1 + $0xb0] sm:$0xff]   ;;  %v829_v25 = vld [vmem:[%s1085_s1 + $0xb8] sm:$0xff]   ;;  %v835_v29 = vld [vmem:[%s1087_s3] sm:$0xff]  }
   0xa   :  { %v832_v23 = vld [vmem:[%s1086_s0 + $0x4] ss:$12 sps:$4 sm:$0xff]   ;;  %v834_v28 = vld [vmem:[%s1086_s0 + $0x8] ss:$12 sps:$4 sm:$0xff]   ;;  %v843_v37 = vld [vmem:[%s1087_s3 + $0x58] sm:$0xff]  }
   0xb   :  { %707 = vmatpush3.bf16.msra.mxu0 %v813_v8  ;;  %273 = vmatprep.mubr.bf16.mxu0 %v832_v23  ;;  %v836_v30 = vld [vmem:[%s1087_s3 + $0x80] sm:$0xff]   ;;  %v837_v31 = vld [vmem:[%s1087_s3 + $0x48] sm:$0xff]   ;;  %v840_v34 = vld [vmem:[%s1087_s3 + $0x50] sm:$0xff]  }
   0xc   :  { %769 = vmatpush3.bf16.msra.mxu1 %v814_v9  ;;  %708 = vmatprep.subr.bf16.mxu0 %v815_v10  ;;  %v838_v32 = vld [vmem:[%s1087_s3 + $0x8] sm:$0xff]   ;;  %v841_v35 = vld [vmem:[%s1087_s3 + $0x10] sm:$0xff]   ;;  %v844_v38 = vld [vmem:[%s1087_s3 + $0x18] sm:$0xff]  }
   0xd   :  { %770 = vmatprep.subr.bf16.mxu1 %v862_v1  ;;  %v839_v33 = vld [vmem:[%s1087_s3 + $0x88] sm:$0xff]   ;;  %v842_v36 = vld [vmem:[%s1087_s3 + $0x90] sm:$0xff]   ;;  %v845_v39 = vld [vmem:[%s1087_s3 + $0x98] sm:$0xff]  }
   0xe   :  { %v846_v40 = vld [vmem:[%s1087_s3 + $0x60] sm:$0xff]   ;;  %v849_v43 = vld [vmem:[%s1087_s3 + $0x68] sm:$0xff]   ;;  %v852_v47 = vld [vmem:[%s1087_s3 + $0x70] sm:$0xff]  }
   0xf   :  { %709 = vmatpush3.bf16.msra.mxu0 %v816_v11  ;;  %v847_v41 = vld [vmem:[%s1087_s3 + $0x20] sm:$0xff]   ;;  %v850_v44 = vld [vmem:[%s1087_s3 + $0x28] sm:$0xff]   ;;  %v853_v48 = vld [vmem:[%s1087_s3 + $0x30] sm:$0xff]  }
  0x10   :  { %771 = vmatpush3.bf16.msra.mxu1 %v817_v12  ;;  %710 = vmatprep.subr.bf16.mxu0 %v818_v13  ;;  %v848_v42 = vld [vmem:[%s1087_s3 + $0xa0] sm:$0xff]   ;;  %v851_v46 = vld [vmem:[%s1087_s3 + $0xa8] sm:$0xff]   ;;  %v854_v49 = vld [vmem:[%s1087_s3 + $0xb0] sm:$0xff]  }
  0x11   :  { %772 = vmatprep.subr.bf16.mxu1 %v862_v1  ;;  %v860_v45 = vld [vmem:[%s1088_s2 + $0x4] ss:$12 sps:$4 sm:$0xff]   ;;  %v855_v50 = vld [vmem:[%s1087_s3 + $0x78] sm:$0xff]   ;;  %v858_v53 = vld [vmem:[%s1088_s2] ss:$12 sps:$4 sm:$0xff]  }
  0x12   :  { %v856_v51 = vld [vmem:[%s1087_s3 + $0x38] sm:$0xff]   ;;  %v861_v54 = vld [vmem:[%s1088_s2 + $0x8] ss:$12 sps:$4 sm:$0xff]  }
  0x13   :  { %711 = vmatpush3.bf16.msra.mxu0 %v819_v14  ;;  %v857_v52 = vld [vmem:[%s1087_s3 + $0xb8] sm:$0xff]   ;;  %v701_v14 = vld [vmem:[%s1089_s4] ss:$0 sm:$0xff] }
  0x14   :  { %773 = vmatpush3.bf16.msra.mxu1 %v820_v15  ;;  %712 = vmatprep.subr.bf16.mxu0 %v821_v16 }
  0x15   :  { %774 = vmatprep.subr.bf16.mxu1 %v862_v1 }
  0x17   :  { %713 = vmatpush3.bf16.msra.mxu0 %v822_v17 }
  0x18   :  { %775 = vmatpush3.bf16.msra.mxu1 %v823_v18  ;;  %714 = vmatprep.subr.bf16.mxu0 %v824_v19 }
  0x19   :  { %776 = vmatprep.subr.bf16.mxu1 %v862_v1 }
  0x1b   :  { %715 = vmatpush3.bf16.msra.mxu0 %v825_v20 }
  0x1c   :  { %777 = vmatpush3.bf16.msra.mxu1 %v826_v21  ;;  %716 = vmatprep.subr.bf16.mxu0 %v827_v22 }
  0x1d   :  { %778 = vmatprep.subr.bf16.mxu1 %v862_v1 }
  0x1f   :  { %717 = vmatpush3.bf16.msra.mxu0 %v828_v24 }
  0x20   :  { %779 = vmatpush3.bf16.msra.mxu1 %v829_v25  ;;  %733 = vmatprep.subr.bf16.mxu0 %v833_v27 }
  0x21   :  { %784 = vmatprep.subr.bf16.mxu1 %v862_v1 }
  0x22   :  { %274 = vmatmul.mubr.bf16.vlgmr.msra.gmra.mrb[0].mxu0 %v830_v26 }
  0x23   :  { %781 = vmatmul.mubr.bf16.vlgmr.msra.gmra.mrb[0].mxu1 %v834_v28  ;;  %734 = vmatpush3.bf16.msra.mxu0 %v835_v29 }
  0x24   :  { %785 = vmatpush3.bf16.msra.mxu1 %v836_v30  ;;  %735 = vmatprep.subr.bf16.mxu0 %v837_v31 }
  0x25   :  { %786 = vmatprep.subr.bf16.mxu1 %v862_v1  ;;  %800 = vmatprep.mubr.msk.bf16.mxu1 %vm863_vm0, %v862_v1 }
  0x26   :  { %573 = vmatprep.mubr.bf16.mxu0 %v860_v45 }
  0x27   :  { %736 = vmatpush3.bf16.msra.mxu0 %v838_v32 }
  0x28   :  { %787 = vmatpush3.bf16.msra.mxu1 %v839_v33  ;;  %737 = vmatprep.subr.bf16.mxu0 %v840_v34 }
  0x29   :  { %788 = vmatprep.subr.bf16.mxu1 %v862_v1 }
  0x2b   :  { %738 = vmatpush3.bf16.msra.mxu0 %v841_v35 }
  0x2c   :  { %789 = vmatpush3.bf16.msra.mxu1 %v842_v36  ;;  %739 = vmatprep.subr.bf16.mxu0 %v843_v37 }
  0x2d   :  { %790 = vmatprep.subr.bf16.mxu1 %v862_v1 }
  0x2f   :  { %740 = vmatpush3.bf16.msra.mxu0 %v844_v38 }
  0x30   :  { %791 = vmatpush3.bf16.msra.mxu1 %v845_v39  ;;  %741 = vmatprep.subr.bf16.mxu0 %v846_v40 }
  0x31   :  { %792 = vmatprep.subr.bf16.mxu1 %v862_v1 }
  0x33   :  { %742 = vmatpush3.bf16.msra.mxu0 %v847_v41 }
  0x34   :  { %793 = vmatpush3.bf16.msra.mxu1 %v848_v42  ;;  %743 = vmatprep.subr.bf16.mxu0 %v849_v43 }
  0x35   :  { %794 = vmatprep.subr.bf16.mxu1 %v862_v1 }
  0x37   :  { %744 = vmatpush3.bf16.msra.mxu0 %v850_v44 }
  0x38   :  { %795 = vmatpush3.bf16.msra.mxu1 %v851_v46  ;;  %745 = vmatprep.subr.bf16.mxu0 %v852_v47 }
  0x39   :  { %796 = vmatprep.subr.bf16.mxu1 %v862_v1 }
  0x3b   :  { %746 = vmatpush3.bf16.msra.mxu0 %v853_v48 }
  0x3c   :  { %797 = vmatpush3.bf16.msra.mxu1 %v854_v49  ;;  %747 = vmatprep.subr.bf16.mxu0 %v855_v50 }
  0x3d   :  { %798 = vmatprep.subr.bf16.mxu1 %v862_v1 }
  0x3f   :  { %748 = vmatpush3.bf16.msra.mxu0 %v856_v51 }
  0x40   :  { %799 = vmatpush3.bf16.msra.mxu1 %v857_v52 }
  0x42   :  { %574 = vmatmul.mubr.bf16.vlgmr.msra.gmra.mrb[4].mxu0 %v858_v53 }
  0x43   :  { %801 = vmatmul.mubr.bf16.vlgmr.msra.gmra.mrb[4].mxu1 %v861_v54 }
  0xf5   :  { %v718_v55 = vpop.f32.mrb[0].mxu0 }
  0xf6   :  { %v719_v56 = vpop.f32.mrb[1].mxu0  ;;  %v316_v57 = vpop.f32.mrb[0].mxu1 }
  0xf7   :  { %v720_v58 = vadd.f32 %v719_v56, %v718_v55  ;;  %v721_v59 = vpop.f32.mrb[2].mxu0  ;;  %v782_v60 = vpop.f32.mrb[1].mxu1 }
  0xf8   :  { %v722_v61 = vpop.f32.mrb[3].mxu0  ;;  %v319_v62 = vpop.f32.mrb[2].mxu1 }
  0xf9   :  { %v317_v63 = vadd.f32 %v720_v58, %v316_v57  ;;  %v723_v0 = vadd.f32 %v722_v61, %v721_v59  ;;  %v783_v1 = vpop.f32.mrb[3].mxu1 }
  0xfb   :  { %v320_v2 = vadd.f32 %v723_v0, %v319_v62 }
 0x115   :  { %v749_v3 = vpop.f32.mrb[4].mxu0 }
 0x116   :  { %v616_v4 = vpop.f32.mrb[4].mxu1  ;;  %v750_v5 = vpop.f32.mrb[5].mxu0 }
 0x117   :  { %v751_v6 = vadd.f32 %v750_v5, %v749_v3  ;;  %v802_v7 = vpop.f32.mrb[5].mxu1  ;;  %v752_v8 = vpop.f32.mrb[6].mxu0 }
 0x118   :  { %v619_v9 = vpop.f32.mrb[6].mxu1  ;;  %v753_v10 = vpop.f32.mrb[7].mxu0 }
 0x119   :  { %v617_v11 = vadd.f32 %v751_v6, %v616_v4  ;;  %v754_v12 = vadd.f32 %v753_v10, %v752_v8  ;;  %v803_v13 = vpop.f32.mrb[7].mxu1 }
 0x11b   :  { %v623_v15 = vadd.f32 %v617_v11, %v317_v63  ;;  %v620_v16 = vadd.f32 %v754_v12, %v619_v9 }
 0x11d   :  { %v639_v17 = vadd.f32 %v701_v14, %v623_v15  ;;  %v624_v18 = vadd.f32 %v620_v16, %v320_v2 }
 0x11f   :  { %641 = vst [vmem:[%s1090_s5] sm:$0xff] %v639_v17  ;;  %v640_v19 = vadd.f32 %v701_v14, %v624_v18 }
 0x121   :  { %642 = vst [vmem:[%s1090_s5 + $0x8] sm:$0xff] %v640_v19 }

</bundles_post_ra>
